<compile_context>
chip_gen: v7x
topology: tpu7x:2x2x1
jax: 0.10.0
libtpu: 0.0.40
codegen_flags: <defaults>
</compile_context>

<pallas_src>
import functools

import jax
import jax.numpy as jnp
from jax import lax
from jax.experimental import pallas as pl
from jax.experimental.pallas import tpu as pltpu  # noqa: F401  (TPU backend)

# Small, self-consistent synthetic config.
B, S, D = 2, 8, 64          # batch, seq, hidden
H = 4                       # attention heads
Dh = D // H                 # head dim
I = 128                     # SwiGLU intermediate size
EPS = 1e-6                  # RMSNorm eps
ROPE_BASE = 10000.0
NUM_OF_LAYERS = 2           # synthetic; last layer applies the final model norm
ROWS = B * S                # batch folded into the row (sublane) dimension


# ----------------------------- Pallas kernel -------------------------------

def _rmsnorm(x, w):
    # x: (ROWS, D), w: (1, D)
    var = jnp.mean(x * x, axis=-1, keepdims=True)
    return x * jax.lax.rsqrt(var + EPS) * w


def block_kernel(is_last,
                 x_ref, cos2_ref, sin2_ref, mask_ref,
                 wp_ref, wo_ref, wgu_ref, wd_ref, norms_ref,
                 out_ref, kv_ref):
    x = x_ref[...]              # (ROWS, D) f32
    cos2 = cos2_ref[...]        # (ROWS, 2D): [cos | ones]
    sin2 = sin2_ref[...]        # (ROWS, 2D): [sin | zeros]
    mask = mask_ref[...]        # (ROWS, ROWS) block-diagonal additive causal mask

    # ---- self-attention block ----
    residual = x
    h = _rmsnorm(x, norms_ref[0:1, :])                 # input_layernorm
    hb = h.astype(jnp.bfloat16)

    # Single fused projection, columns = [Wk | Wv | Wk@R | Wq@R | Wq], with
    # R = per-head rotate-half signed permutation and the 1/sqrt(Dh) scale
    # pre-folded into the Wq blocks (done once in the wrapper, bit-exact).
    proj = jnp.dot(hb, wp_ref[...], preferred_element_type=jnp.float32)   # (ROWS, 5D)

    # RoPE applied full-width. kv = [K*cos + (K@R)*sin | V*1 + (Q@R)*0]
    # -> both operand slices are 128-lane aligned; one lane-dense (16,128) store.
    kv = proj[:, :2 * D] * cos2 + proj[:, 2 * D:4 * D] * sin2
    kv_ref[...] = kv

    # q already carries the 1/sqrt(Dh) scale (folded into Wq).
    q = proj[:, 4 * D:5 * D] * cos2[:, :D] + proj[:, 3 * D:4 * D] * sin2[:, :D]

    dn = (((1,), (1,)), ((), ()))                       # contract last dims (q @ k.T, no transpose op)
    ctxs = []
    for hh in range(H):                                 # static unroll over heads
        sl = slice(hh * Dh, (hh + 1) * Dh)
        s = lax.dot_general(q[:, sl], kv[:, sl], dn,
                            preferred_element_type=jnp.float32)           # (ROWS, ROWS)
        s = s + mask                                    # block-diag causal (+ cross-batch -1e9)
        s = s - jnp.max(s, axis=-1, keepdims=True)
        p = jnp.exp(s)
        p = p * pl.reciprocal(jnp.sum(p, axis=-1, keepdims=True), approx=True)
        ctxs.append(jnp.dot(p, kv[:, D + hh * Dh:D + (hh + 1) * Dh],
                            preferred_element_type=jnp.float32))          # (ROWS, Dh)

    # One (ROWS, D) @ (D, D) output projection instead of 4 per-head matmuls.
    ctx = jnp.concatenate(ctxs, axis=-1)                # (ROWS, D)
    attn = jnp.dot(ctx.astype(jnp.bfloat16), wo_ref[...],
                   preferred_element_type=jnp.float32)

    h = residual + attn

    # ---- MLP block (SwiGLU) ----
    residual = h
    h2 = _rmsnorm(h, norms_ref[1:2, :])                 # post_attention_layernorm
    gu = jnp.dot(h2.astype(jnp.bfloat16), wgu_ref[...],
                 preferred_element_type=jnp.float32)    # fused gate|up (ROWS, 2I)
    g = gu[:, :I]
    u = gu[:, I:]
    m = (g * jax.nn.sigmoid(g)) * u                     # SiLU(gate) * up
    m = jnp.dot(m.astype(jnp.bfloat16), wd_ref[...],
                preferred_element_type=jnp.float32)     # down_proj

    out = residual + m
    if is_last:                     # static python bool (layer_id == last)
        out = _rmsnorm(out, norms_ref[2:3, :])          # model-final RMSNorm
    out_ref[...] = out


# --------------------------- one-time weight prep ----------------------------

def _rotate_half_matrix():
    """(D, D) signed permutation R s.t. rotate_half(x) == x @ R per Dh-sized head block."""
    idx = jnp.arange(D)
    pos = idx % Dh
    half = Dh // 2
    src = jnp.where(pos < half, idx + half, idx - half)
    sign = jnp.where(pos < half, -1.0, 1.0).astype(jnp.float32)
    return jnp.zeros((D, D), jnp.float32).at[src, idx].set(sign)


def prepare_fused_params(params):
    """Hoisted out of the forward path: runs ONCE (weight fusion, casts, constants)."""
    Rm = _rotate_half_matrix()
    scale = 1.0 / (Dh ** 0.5)                           # 0.25: power of two, exact in bf16
    wq_s = params["wq"] * scale
    # Column order [Wk | Wv | Wk@R | Wq@R | Wq] -> vreg-aligned RoPE/KV slices in-kernel.
    wp = jnp.concatenate(
        [params["wk"], params["wv"], params["wk"] @ Rm, wq_s @ Rm, wq_s],
        axis=1).astype(jnp.bfloat16)                                            # (D, 5D)
    wgu = jnp.concatenate([params["wg"], params["wu"]], axis=1).astype(jnp.bfloat16)  # (D, 2I)
    wo = params["wo"].astype(jnp.bfloat16)
    wd = params["wd"].astype(jnp.bfloat16)
    norms = jnp.concatenate([params["ln1"], params["ln2"], params["fnorm"]], axis=0)   # (3, D)
    # Static cross-batch bias for the folded-row attention (-1e9 across batches).
    row_b = jnp.arange(ROWS) // S
    cross_bias = jnp.where(row_b[:, None] == row_b[None, :], 0.0, -1e9).astype(jnp.float32)
    return {"wp": wp, "wo": wo, "wgu": wgu, "wd": wd, "norms": norms,
            "cross_bias": cross_bias}


# ------------------------------- wrapper ------------------------------------

def block_forward(layer_id, hidden_states, position_ids, attention_mask, fused):
    """Equivalent of Block(layer_id).forward(hidden_states, position_ids, attention_mask)."""
    is_last = (layer_id == NUM_OF_LAYERS - 1)

    # Rotary cos/sin tables (cheap per-call glue), tiled per head to full hidden
    # width, then widened to 2D with [ |ones ] / [ |zeros ] for the fused KV RoPE.
    inv_freq = 1.0 / (ROPE_BASE ** (jnp.arange(0, Dh, 2, dtype=jnp.float32) / Dh))
    freqs = position_ids.astype(jnp.float32)[..., None] * inv_freq[None, None, :]
    emb = jnp.concatenate([freqs, freqs], axis=-1)                  # (B, S, Dh)
    cos = jnp.tile(jnp.cos(emb), (1, 1, H)).reshape(ROWS, D)
    sin = jnp.tile(jnp.sin(emb), (1, 1, H)).reshape(ROWS, D)
    cos2 = jnp.concatenate([cos, jnp.ones((ROWS, D), jnp.float32)], axis=-1)   # (ROWS, 2D)
    sin2 = jnp.concatenate([sin, jnp.zeros((ROWS, D), jnp.float32)], axis=-1)  # (ROWS, 2D)

    # Block-diagonal additive mask over the folded B*S row axis (vectorized embed,
    # no per-batch scatter loop); cross-batch bias is a one-time constant.
    block_mask = (attention_mask[:, :, None, :] *
                  jnp.eye(B, dtype=jnp.float32)[:, None, :, None]).reshape(ROWS, ROWS)
    big_mask = block_mask + fused["cross_bias"]

    x2 = hidden_states.reshape(ROWS, D)

    # Single kernel invocation, no grid (batch folded into rows): everything in VMEM.
    # TODO(synk): if B*S grows past a few hundred rows, add a 1-D "parallel" row grid
    # with weights kept resident via constant index_maps.
    out2, kv = pl.pallas_call(
        functools.partial(block_kernel, is_last),
        out_shape=(jax.ShapeDtypeStruct((ROWS, D), jnp.float32),
                   jax.ShapeDtypeStruct((ROWS, 2 * D), jnp.float32)),
    )(x2, cos2, sin2, big_mask,
      fused["wp"], fused["wo"], fused["wgu"], fused["wd"], fused["norms"])

    out = out2.reshape(B, S, D)
    # kv layout per row: [k_head0..k_head3 | v_head0..v_head3] -> (B, H, S, Dh).
    kv5 = kv.reshape(B, S, 2, H, Dh)
    present_k = kv5[:, :, 0].transpose(0, 2, 1, 3)
    present_v = kv5[:, :, 1].transpose(0, 2, 1, 3)
    return out, present_k, present_v


# --------------------------- pure-JAX reference ------------------------------

def block_reference(layer_id, x, position_ids, attention_mask, params):
    is_last = (layer_id == NUM_OF_LAYERS - 1)
    inv_freq = 1.0 / (ROPE_BASE ** (jnp.arange(0, Dh, 2, dtype=jnp.float32) / Dh))
    freqs = position_ids.astype(jnp.float32)[..., None] * inv_freq[None, None, :]
    emb = jnp.concatenate([freqs, freqs], axis=-1)           # (B, S, Dh)
    cos = jnp.cos(emb)[:, None, :, :]
    sin = jnp.sin(emb)[:, None, :, :]

    def rms(t, w):
        var = jnp.mean(t * t, axis=-1, keepdims=True)
        return t * jax.lax.rsqrt(var + EPS) * w[0]

    def rot_half(t):
        half = t.shape[-1] // 2
        return jnp.concatenate([-t[..., half:], t[..., :half]], axis=-1)

    residual = x
    h = rms(x, params["ln1"])
    q = h @ params["wq"]
    k = h @ params["wk"]
    v = h @ params["wv"]
    to_heads = lambda t: t.reshape(B, S, H, Dh).transpose(0, 2, 1, 3)
    q, k, v = to_heads(q), to_heads(k), to_heads(v)
    q = q * cos + rot_half(q) * sin
    k = k * cos + rot_half(k) * sin
    pk, pv = k, v
    scores = jnp.einsum("bhqd,bhkd->bhqk", q, k) / (Dh ** 0.5)
    scores = scores + attention_mask[:, None, :, :]
    p = jax.nn.softmax(scores, axis=-1)
    o = jnp.einsum("bhqk,bhkd->bhqd", p, v)
    o = o.transpose(0, 2, 1, 3).reshape(B, S, D) @ params["wo"]
    h = residual + o
    residual = h
    h2 = rms(h, params["ln2"])
    m = (jax.nn.silu(h2 @ params["wg"]) * (h2 @ params["wu"])) @ params["wd"]
    out = residual + m
    if is_last:
        out = rms(out, params["fnorm"])
    return out, pk, pv


# --------------------------------- main --------------------------------------

if __name__ == "__main__":
    key = jax.random.PRNGKey(0)
    ks = jax.random.split(key, 9)
    scale = 0.05
    params = {
        "wq": jax.random.normal(ks[0], (D, D), jnp.float32) * scale,
        "wk": jax.random.normal(ks[1], (D, D), jnp.float32) * scale,
        "wv": jax.random.normal(ks[2], (D, D), jnp.float32) * scale,
        "wo": jax.random.normal(ks[3], (D, D), jnp.float32) * scale,
        "wg": jax.random.normal(ks[4], (D, I), jnp.float32) * scale,
        "wu": jax.random.normal(ks[5], (D, I), jnp.float32) * scale,
        "wd": jax.random.normal(ks[6], (I, D), jnp.float32) * scale,
        "ln1": jnp.ones((1, D), jnp.float32),
        "ln2": jnp.ones((1, D), jnp.float32),
        "fnorm": jnp.ones((1, D), jnp.float32),
    }

    x = jax.random.normal(ks[7], (B, S, D), jnp.float32)
    position_ids = jnp.broadcast_to(jnp.arange(S, dtype=jnp.int32)[None, :], (B, S))
    causal = jnp.tril(jnp.ones((S, S), jnp.float32))
    attention_mask = jnp.broadcast_to(
        jnp.where(causal == 1.0, 0.0, -1e9).astype(jnp.float32)[None], (B, S, S))

    layer_id = NUM_OF_LAYERS - 1   # exercise the final-RMSNorm branch

    fused = prepare_fused_params(params)           # one-time weight fusion (hoisted)
    jax.block_until_ready(fused)

    out, present_k, present_v = block_forward(
        layer_id, x, position_ids, attention_mask, fused)
    jax.block_until_ready((out, present_k, present_v))

    ref_out, ref_k, ref_v = block_reference(
        layer_id, x, position_ids, attention_mask, params)
    # bf16 matmul operands (f32 accumulation) -> use a looser tolerance than f32.
    assert jnp.allclose(out, ref_out, atol=2e-2, rtol=2e-2)
    assert jnp.allclose(present_k, ref_k, atol=2e-2, rtol=2e-2)
    assert jnp.allclose(present_v, ref_v, atol=2e-2, rtol=2e-2)

    print("KERNEL_OK")
</pallas_src>

<mosaic_0001>
module attributes {stable_mosaic.version = 11 : i64} {
  func.func @block_kernel(%arg0: memref<16x64xf32, #tpu.memory_space<vmem>>, %arg1: memref<16x128xf32, #tpu.memory_space<vmem>>, %arg2: memref<16x128xf32, #tpu.memory_space<vmem>>, %arg3: memref<16x16xf32, #tpu.memory_space<vmem>>, %arg4: memref<64x320xbf16, #tpu.memory_space<vmem>>, %arg5: memref<64x64xbf16, #tpu.memory_space<vmem>>, %arg6: memref<64x256xbf16, #tpu.memory_space<vmem>>, %arg7: memref<128x64xbf16, #tpu.memory_space<vmem>>, %arg8: memref<3x64xf32, #tpu.memory_space<vmem>>, %arg9: memref<16x64xf32, #tpu.memory_space<vmem>>, %arg10: memref<16x128xf32, #tpu.memory_space<vmem>>) attributes {dimension_semantics = [], scalar_prefetch = 0 : i64, scratch_operands = 0 : i64, tpu.core_type = #tpu.core_type<tc>} {
    %c0 = arith.constant 0 : index
    %c0_0 = arith.constant 0 : index
    %0 = vector.load %arg0[%c0, %c0_0] : memref<16x64xf32, #tpu.memory_space<vmem>>, vector<16x64xf32>
    %c0_1 = arith.constant 0 : index
    %c0_2 = arith.constant 0 : index
    %1 = vector.load %arg1[%c0_1, %c0_2] : memref<16x128xf32, #tpu.memory_space<vmem>>, vector<16x128xf32>
    %c0_3 = arith.constant 0 : index
    %c0_4 = arith.constant 0 : index
    %2 = vector.load %arg2[%c0_3, %c0_4] : memref<16x128xf32, #tpu.memory_space<vmem>>, vector<16x128xf32>
    %c0_5 = arith.constant 0 : index
    %c0_6 = arith.constant 0 : index
    %3 = vector.load %arg3[%c0_5, %c0_6] : memref<16x16xf32, #tpu.memory_space<vmem>>, vector<16x16xf32>
    %c0_7 = arith.constant 0 : index
    %c0_8 = arith.constant 0 : index
    %4 = vector.load %arg8[%c0_7, %c0_8] : memref<3x64xf32, #tpu.memory_space<vmem>>, vector<1x64xf32>
    %5 = arith.mulf %0, %0 : vector<16x64xf32>
    %cst = arith.constant dense<0.000000e+00> : vector<16xf32>
    %6 = vector.multi_reduction <add>, %5, %cst [1] : vector<16x64xf32> to vector<16xf32>
    %7 = vector.shape_cast %6 : vector<16xf32> to vector<16x1xf32>
    %cst_9 = arith.constant 6.400000e+01 : f32
    %8 = vector.broadcast %cst_9 : f32 to vector<16x1xf32>
    %9 = arith.divf %7, %8 : vector<16x1xf32>
    %cst_10 = arith.constant 9.99999997E-7 : f32
    %10 = vector.broadcast %cst_10 : f32 to vector<16x1xf32>
    %11 = arith.addf %9, %10 : vector<16x1xf32>
    %12 = math.rsqrt %11 : vector<16x1xf32>
    %13 = vector.broadcast %12 : vector<16x1xf32> to vector<16x64xf32>
    %14 = arith.mulf %0, %13 : vector<16x64xf32>
    %15 = vector.broadcast %4 : vector<1x64xf32> to vector<16x64xf32>
    %16 = arith.mulf %14, %15 : vector<16x64xf32>
    %17 = arith.truncf %16 : vector<16x64xf32> to vector<16x64xbf16>
    %c0_11 = arith.constant 0 : index
    %c0_12 = arith.constant 0 : index
    %18 = vector.load %arg4[%c0_11, %c0_12] : memref<64x320xbf16, #tpu.memory_space<vmem>>, vector<64x320xbf16>
    %cst_13 = arith.constant dense<0.000000e+00> : vector<16x320xf32>
    %19 = tpu.matmul %17, %18, %cst_13 {dimension_numbers = #tpu.dot_dimension_numbers<[1], [0], [0], [1], [0, 0, 1, 1], [], []>} : vector<16x64xbf16>, vector<64x320xbf16>, vector<16x320xf32> -> vector<16x320xf32>
    %20 = vector.extract_strided_slice %19 {offsets = [0, 0], sizes = [16, 128], strides = [1, 1]} : vector<16x320xf32> to vector<16x128xf32>
    %21 = arith.mulf %20, %1 : vector<16x128xf32>
    %22 = vector.extract_strided_slice %19 {offsets = [0, 128], sizes = [16, 128], strides = [1, 1]} : vector<16x320xf32> to vector<16x128xf32>
    %23 = arith.mulf %22, %2 : vector<16x128xf32>
    %24 = arith.addf %21, %23 : vector<16x128xf32>
    %c0_14 = arith.constant 0 : index
    %c0_15 = arith.constant 0 : index
    %25 = vector.load %arg10[%c0_14, %c0_15] : memref<16x128xf32, #tpu.memory_space<vmem>>, vector<16x128xf32>
    tpu.vector_store %arg10[%c0_14, %c0_15], %24 {strides = array<i32>} : memref<16x128xf32, #tpu.memory_space<vmem>>, vector<16x128xf32>,
    %26 = vector.extract_strided_slice %19 {offsets = [0, 256], sizes = [16, 64], strides = [1, 1]} : vector<16x320xf32> to vector<16x64xf32>
    %27 = vector.extract_strided_slice %1 {offsets = [0, 0], sizes = [16, 64], strides = [1, 1]} : vector<16x128xf32> to vector<16x64xf32>
    %28 = arith.mulf %26, %27 : vector<16x64xf32>
    %29 = vector.extract_strided_slice %19 {offsets = [0, 192], sizes = [16, 64], strides = [1, 1]} : vector<16x320xf32> to vector<16x64xf32>
    %30 = vector.extract_strided_slice %2 {offsets = [0, 0], sizes = [16, 64], strides = [1, 1]} : vector<16x128xf32> to vector<16x64xf32>
    %31 = arith.mulf %29, %30 : vector<16x64xf32>
    %32 = arith.addf %28, %31 : vector<16x64xf32>
    %33 = vector.extract_strided_slice %32 {offsets = [0, 0], sizes = [16, 16], strides = [1, 1]} : vector<16x64xf32> to vector<16x16xf32>
    %34 = vector.extract_strided_slice %24 {offsets = [0, 0], sizes = [16, 16], strides = [1, 1]} : vector<16x128xf32> to vector<16x16xf32>
    %cst_16 = arith.constant dense<0.000000e+00> : vector<16x16xf32>
    %35 = tpu.matmul %33, %34, %cst_16 {dimension_numbers = #tpu.dot_dimension_numbers<[1], [1], [0], [0], [0, 0, 1, 0], [], []>} : vector<16x16xf32>, vector<16x16xf32>, vector<16x16xf32> -> vector<16x16xf32>
    %36 = arith.addf %35, %3 : vector<16x16xf32>
    %cst_17 = arith.constant dense<0xFF800000> : vector<16xf32>
    %37 = vector.multi_reduction <maximumf>, %36, %cst_17 [1] : vector<16x16xf32> to vector<16xf32>
    %38 = vector.shape_cast %37 : vector<16xf32> to vector<16x1xf32>
    %39 = vector.broadcast %38 : vector<16x1xf32> to vector<16x16xf32>
    %40 = arith.subf %36, %39 : vector<16x16xf32>
    %41 = math.exp %40 : vector<16x16xf32>
    %cst_18 = arith.constant dense<0.000000e+00> : vector<16xf32>
    %42 = vector.multi_reduction <add>, %41, %cst_18 [1] : vector<16x16xf32> to vector<16xf32>
    %43 = vector.shape_cast %42 : vector<16xf32> to vector<16x1xf32>
    %44 = tpu.reciprocal %43 {approx = true} : vector<16x1xf32> -> vector<16x1xf32>
    %45 = vector.broadcast %44 : vector<16x1xf32> to vector<16x16xf32>
    %46 = arith.mulf %41, %45 : vector<16x16xf32>
    %47 = vector.extract_strided_slice %24 {offsets = [0, 64], sizes = [16, 16], strides = [1, 1]} : vector<16x128xf32> to vector<16x16xf32>
    %cst_19 = arith.constant dense<0.000000e+00> : vector<16x16xf32>
    %48 = tpu.matmul %46, %47, %cst_19 {dimension_numbers = #tpu.dot_dimension_numbers<[1], [0], [0], [1], [0, 0, 1, 1], [], []>} : vector<16x16xf32>, vector<16x16xf32>, vector<16x16xf32> -> vector<16x16xf32>
    %49 = vector.extract_strided_slice %32 {offsets = [0, 16], sizes = [16, 16], strides = [1, 1]} : vector<16x64xf32> to vector<16x16xf32>
    %50 = vector.extract_strided_slice %24 {offsets = [0, 16], sizes = [16, 16], strides = [1, 1]} : vector<16x128xf32> to vector<16x16xf32>
    %cst_20 = arith.constant dense<0.000000e+00> : vector<16x16xf32>
    %51 = tpu.matmul %49, %50, %cst_20 {dimension_numbers = #tpu.dot_dimension_numbers<[1], [1], [0], [0], [0, 0, 1, 0], [], []>} : vector<16x16xf32>, vector<16x16xf32>, vector<16x16xf32> -> vector<16x16xf32>
    %52 = arith.addf %51, %3 : vector<16x16xf32>
    %cst_21 = arith.constant dense<0xFF800000> : vector<16xf32>
    %53 = vector.multi_reduction <maximumf>, %52, %cst_21 [1] : vector<16x16xf32> to vector<16xf32>
    %54 = vector.shape_cast %53 : vector<16xf32> to vector<16x1xf32>
    %55 = vector.broadcast %54 : vector<16x1xf32> to vector<16x16xf32>
    %56 = arith.subf %52, %55 : vector<16x16xf32>
    %57 = math.exp %56 : vector<16x16xf32>
    %cst_22 = arith.constant dense<0.000000e+00> : vector<16xf32>
    %58 = vector.multi_reduction <add>, %57, %cst_22 [1] : vector<16x16xf32> to vector<16xf32>
    %59 = vector.shape_cast %58 : vector<16xf32> to vector<16x1xf32>
    %60 = tpu.reciprocal %59 {approx = true} : vector<16x1xf32> -> vector<16x1xf32>
    %61 = vector.broadcast %60 : vector<16x1xf32> to vector<16x16xf32>
    %62 = arith.mulf %57, %61 : vector<16x16xf32>
    %63 = vector.extract_strided_slice %24 {offsets = [0, 80], sizes = [16, 16], strides = [1, 1]} : vector<16x128xf32> to vector<16x16xf32>
    %cst_23 = arith.constant dense<0.000000e+00> : vector<16x16xf32>
    %64 = tpu.matmul %62, %63, %cst_23 {dimension_numbers = #tpu.dot_dimension_numbers<[1], [0], [0], [1], [0, 0, 1, 1], [], []>} : vector<16x16xf32>, vector<16x16xf32>, vector<16x16xf32> -> vector<16x16xf32>
    %65 = vector.extract_strided_slice %32 {offsets = [0, 32], sizes = [16, 16], strides = [1, 1]} : vector<16x64xf32> to vector<16x16xf32>
    %66 = vector.extract_strided_slice %24 {offsets = [0, 32], sizes = [16, 16], strides = [1, 1]} : vector<16x128xf32> to vector<16x16xf32>
    %cst_24 = arith.constant dense<0.000000e+00> : vector<16x16xf32>
    %67 = tpu.matmul %65, %66, %cst_24 {dimension_numbers = #tpu.dot_dimension_numbers<[1], [1], [0], [0], [0, 0, 1, 0], [], []>} : vector<16x16xf32>, vector<16x16xf32>, vector<16x16xf32> -> vector<16x16xf32>
    %68 = arith.addf %67, %3 : vector<16x16xf32>
    %cst_25 = arith.constant dense<0xFF800000> : vector<16xf32>
    %69 = vector.multi_reduction <maximumf>, %68, %cst_25 [1] : vector<16x16xf32> to vector<16xf32>
    %70 = vector.shape_cast %69 : vector<16xf32> to vector<16x1xf32>
    %71 = vector.broadcast %70 : vector<16x1xf32> to vector<16x16xf32>
    %72 = arith.subf %68, %71 : vector<16x16xf32>
    %73 = math.exp %72 : vector<16x16xf32>
    %cst_26 = arith.constant dense<0.000000e+00> : vector<16xf32>
    %74 = vector.multi_reduction <add>, %73, %cst_26 [1] : vector<16x16xf32> to vector<16xf32>
    %75 = vector.shape_cast %74 : vector<16xf32> to vector<16x1xf32>
    %76 = tpu.reciprocal %75 {approx = true} : vector<16x1xf32> -> vector<16x1xf32>
    %77 = vector.broadcast %76 : vector<16x1xf32> to vector<16x16xf32>
    %78 = arith.mulf %73, %77 : vector<16x16xf32>
    %79 = vector.extract_strided_slice %24 {offsets = [0, 96], sizes = [16, 16], strides = [1, 1]} : vector<16x128xf32> to vector<16x16xf32>
    %cst_27 = arith.constant dense<0.000000e+00> : vector<16x16xf32>
    %80 = tpu.matmul %78, %79, %cst_27 {dimension_numbers = #tpu.dot_dimension_numbers<[1], [0], [0], [1], [0, 0, 1, 1], [], []>} : vector<16x16xf32>, vector<16x16xf32>, vector<16x16xf32> -> vector<16x16xf32>
    %81 = vector.extract_strided_slice %32 {offsets = [0, 48], sizes = [16, 16], strides = [1, 1]} : vector<16x64xf32> to vector<16x16xf32>
    %82 = vector.extract_strided_slice %24 {offsets = [0, 48], sizes = [16, 16], strides = [1, 1]} : vector<16x128xf32> to vector<16x16xf32>
    %cst_28 = arith.constant dense<0.000000e+00> : vector<16x16xf32>
    %83 = tpu.matmul %81, %82, %cst_28 {dimension_numbers = #tpu.dot_dimension_numbers<[1], [1], [0], [0], [0, 0, 1, 0], [], []>} : vector<16x16xf32>, vector<16x16xf32>, vector<16x16xf32> -> vector<16x16xf32>
    %84 = arith.addf %83, %3 : vector<16x16xf32>
    %cst_29 = arith.constant dense<0xFF800000> : vector<16xf32>
    %85 = vector.multi_reduction <maximumf>, %84, %cst_29 [1] : vector<16x16xf32> to vector<16xf32>
    %86 = vector.shape_cast %85 : vector<16xf32> to vector<16x1xf32>
    %87 = vector.broadcast %86 : vector<16x1xf32> to vector<16x16xf32>
    %88 = arith.subf %84, %87 : vector<16x16xf32>
    %89 = math.exp %88 : vector<16x16xf32>
    %cst_30 = arith.constant dense<0.000000e+00> : vector<16xf32>
    %90 = vector.multi_reduction <add>, %89, %cst_30 [1] : vector<16x16xf32> to vector<16xf32>
    %91 = vector.shape_cast %90 : vector<16xf32> to vector<16x1xf32>
    %92 = tpu.reciprocal %91 {approx = true} : vector<16x1xf32> -> vector<16x1xf32>
    %93 = vector.broadcast %92 : vector<16x1xf32> to vector<16x16xf32>
    %94 = arith.mulf %89, %93 : vector<16x16xf32>
    %95 = vector.extract_strided_slice %24 {offsets = [0, 112], sizes = [16, 16], strides = [1, 1]} : vector<16x128xf32> to vector<16x16xf32>
    %cst_31 = arith.constant dense<0.000000e+00> : vector<16x16xf32>
    %96 = tpu.matmul %94, %95, %cst_31 {dimension_numbers = #tpu.dot_dimension_numbers<[1], [0], [0], [1], [0, 0, 1, 1], [], []>} : vector<16x16xf32>, vector<16x16xf32>, vector<16x16xf32> -> vector<16x16xf32>
    %97 = tpu.concatenate %48, %64, %80, %96 in 1 : vector<16x16xf32>, vector<16x16xf32>, vector<16x16xf32>, vector<16x16xf32> -> vector<16x64xf32>
    %98 = arith.truncf %97 : vector<16x64xf32> to vector<16x64xbf16>
    %c0_32 = arith.constant 0 : index
    %c0_33 = arith.constant 0 : index
    %99 = vector.load %arg5[%c0_32, %c0_33] : memref<64x64xbf16, #tpu.memory_space<vmem>>, vector<64x64xbf16>
    %cst_34 = arith.constant dense<0.000000e+00> : vector<16x64xf32>
    %100 = tpu.matmul %98, %99, %cst_34 {dimension_numbers = #tpu.dot_dimension_numbers<[1], [0], [0], [1], [0, 0, 1, 1], [], []>} : vector<16x64xbf16>, vector<64x64xbf16>, vector<16x64xf32> -> vector<16x64xf32>
    %101 = arith.addf %0, %100 : vector<16x64xf32>
    %c1 = arith.constant 1 : index
    %c0_35 = arith.constant 0 : index
    %102 = vector.load %arg8[%c1, %c0_35] : memref<3x64xf32, #tpu.memory_space<vmem>>, vector<1x64xf32>
    %103 = arith.mulf %101, %101 : vector<16x64xf32>
    %cst_36 = arith.constant dense<0.000000e+00> : vector<16xf32>
    %104 = vector.multi_reduction <add>, %103, %cst_36 [1] : vector<16x64xf32> to vector<16xf32>
    %105 = vector.shape_cast %104 : vector<16xf32> to vector<16x1xf32>
    %cst_37 = arith.constant 6.400000e+01 : f32
    %106 = vector.broadcast %cst_37 : f32 to vector<16x1xf32>
    %107 = arith.divf %105, %106 : vector<16x1xf32>
    %cst_38 = arith.constant 9.99999997E-7 : f32
    %108 = vector.broadcast %cst_38 : f32 to vector<16x1xf32>
    %109 = arith.addf %107, %108 : vector<16x1xf32>
    %110 = math.rsqrt %109 : vector<16x1xf32>
    %111 = vector.broadcast %110 : vector<16x1xf32> to vector<16x64xf32>
    %112 = arith.mulf %101, %111 : vector<16x64xf32>
    %113 = vector.broadcast %102 : vector<1x64xf32> to vector<16x64xf32>
    %114 = arith.mulf %112, %113 : vector<16x64xf32>
    %115 = arith.truncf %114 : vector<16x64xf32> to vector<16x64xbf16>
    %c0_39 = arith.constant 0 : index
    %c0_40 = arith.constant 0 : index
    %116 = vector.load %arg6[%c0_39, %c0_40] : memref<64x256xbf16, #tpu.memory_space<vmem>>, vector<64x256xbf16>
    %cst_41 = arith.constant dense<0.000000e+00> : vector<16x256xf32>
    %117 = tpu.matmul %115, %116, %cst_41 {dimension_numbers = #tpu.dot_dimension_numbers<[1], [0], [0], [1], [0, 0, 1, 1], [], []>} : vector<16x64xbf16>, vector<64x256xbf16>, vector<16x256xf32> -> vector<16x256xf32>
    %118 = vector.extract_strided_slice %117 {offsets = [0, 0], sizes = [16, 128], strides = [1, 1]} : vector<16x256xf32> to vector<16x128xf32>
    %119 = vector.extract_strided_slice %117 {offsets = [0, 128], sizes = [16, 128], strides = [1, 1]} : vector<16x256xf32> to vector<16x128xf32>
    %120 = arith.negf %118 : vector<16x128xf32>
    %121 = math.exp %120 : vector<16x128xf32>
    %cst_42 = arith.constant 1.000000e+00 : f32
    %122 = vector.broadcast %cst_42 : f32 to vector<16x128xf32>
    %123 = arith.addf %122, %121 : vector<16x128xf32>
    %124 = arith.divf %122, %123 : vector<16x128xf32>
    %125 = arith.mulf %118, %124 : vector<16x128xf32>
    %126 = arith.mulf %125, %119 : vector<16x128xf32>
    %127 = arith.truncf %126 : vector<16x128xf32> to vector<16x128xbf16>
    %c0_43 = arith.constant 0 : index
    %c0_44 = arith.constant 0 : index
    %128 = vector.load %arg7[%c0_43, %c0_44] : memref<128x64xbf16, #tpu.memory_space<vmem>>, vector<128x64xbf16>
    %cst_45 = arith.constant dense<0.000000e+00> : vector<16x64xf32>
    %129 = tpu.matmul %127, %128, %cst_45 {dimension_numbers = #tpu.dot_dimension_numbers<[1], [0], [0], [1], [0, 0, 1, 1], [], []>} : vector<16x128xbf16>, vector<128x64xbf16>, vector<16x64xf32> -> vector<16x64xf32>
    %130 = arith.addf %101, %129 : vector<16x64xf32>
    %c2 = arith.constant 2 : index
    %c0_46 = arith.constant 0 : index
    %131 = vector.load %arg8[%c2, %c0_46] : memref<3x64xf32, #tpu.memory_space<vmem>>, vector<1x64xf32>
    %132 = arith.mulf %130, %130 : vector<16x64xf32>
    %cst_47 = arith.constant dense<0.000000e+00> : vector<16xf32>
    %133 = vector.multi_reduction <add>, %132, %cst_47 [1] : vector<16x64xf32> to vector<16xf32>
    %134 = vector.shape_cast %133 : vector<16xf32> to vector<16x1xf32>
    %cst_48 = arith.constant 6.400000e+01 : f32
    %135 = vector.broadcast %cst_48 : f32 to vector<16x1xf32>
    %136 = arith.divf %134, %135 : vector<16x1xf32>
    %cst_49 = arith.constant 9.99999997E-7 : f32
    %137 = vector.broadcast %cst_49 : f32 to vector<16x1xf32>
    %138 = arith.addf %136, %137 : vector<16x1xf32>
    %139 = math.rsqrt %138 : vector<16x1xf32>
    %140 = vector.broadcast %139 : vector<16x1xf32> to vector<16x64xf32>
    %141 = arith.mulf %130, %140 : vector<16x64xf32>
    %142 = vector.broadcast %131 : vector<1x64xf32> to vector<16x64xf32>
    %143 = arith.mulf %141, %142 : vector<16x64xf32>
    %c0_50 = arith.constant 0 : index
    %c0_51 = arith.constant 0 : index
    %144 = vector.load %arg9[%c0_50, %c0_51] : memref<16x64xf32, #tpu.memory_space<vmem>>, vector<16x64xf32>
    tpu.vector_store %arg9[%c0_50, %c0_51], %143 {strides = array<i32>} : memref<16x64xf32, #tpu.memory_space<vmem>>, vector<16x64xf32>,
    return
  }
}

</mosaic_0001>

<bundles_post_ra>
// kernel: tpu_custom_call.1
= control target key start
LH: loop header
LB: loop body
LE: loop exit
PB: predicated region body
PF: predicated region fallthrough
CT: control target
= control target key end

     0   :  { %16 = vsyncpa [#allocation3], 0  ;;  %s2610_s0 = inlined_call_operand.hbm [shape: f32[16,64], index: 0, kind: input, shape index: {}]   ;;  %s2611_s1 = inlined_call_operand.hbm [shape: f32[16,128], index: 1, kind: input, shape index: {}]   ;;  %s2612_s2 = inlined_call_operand.hbm [shape: f32[16,128], index: 2, kind: input, shape index: {}]   ;;  %s2613_s3 = inlined_call_operand.hbm [shape: f32[16,16], index: 3, kind: input, shape index: {}]   ;;  %s2614_s4 = inlined_call_operand.vmem [shape: bf16[64,320], index: 4, kind: input, shape index: {}]   ;;  %s2615_s5 = inlined_call_operand.hbm [shape: bf16[64,64], index: 5, kind: input, shape index: {}]   ;;  %s2616_s6 = inlined_call_operand.hbm [shape: bf16[64,256], index: 6, kind: input, shape index: {}]   ;;  %s2617_s7 = inlined_call_operand.vmem [shape: bf16[128,64], index: 7, kind: input, shape index: {}]   ;;  %s2618_s8 = inlined_call_operand.vmem [shape: f32[3,64], index: 8, kind: input, shape index: {}]   ;;  %s2619_s9 = inlined_call_operand.hbm [shape: f32[16,64], index: 9, kind: output, shape index: {0}]   ;;  %s2620_s10 = inlined_call_operand.hbm [shape: f32[16,128], index: 10, kind: output, shape index: {1}]  }
   0x1   :  { %17 = vsyncpa [#allocation6], 0 }
   0x2   :  { %18 = vsyncpa [#allocation9], 0 }
   0x3   :  { %19 = vsyncpa [#allocation12], 0 }
   0x4   :  { %20 = vsyncpa [#allocation4], 0 }
   0x5   :  { %21 = vsyncpa [#allocation15], 0  ;;  %s2168_s13 = smov [#allocation5]   ;;  %s2169_s15 = smov [#allocation8]  }
   0x6   :  { %s39_s14 = sshll.u32 %s2168_s13, 4  ;;  %s63_s16 = sshll.u32 %s2169_s15, 4  ;;  %s40_s14 = int_to_ptr.vmem [resolvable:$true] %s39_s14  ;;  %s2244_s16 = int_to_ptr.vmem [resolvable:$true] %s63_s16 }
   0x7   :  { %s1980_s19 = scalar_lea.hbm %s2611_s1, 256 }
   0x8   :  { %p1981_p0 = scmp.ne.s32.totalorder %s2611_s1, %s1980_s19  ;;  %p1984_p1 = scmp.lt.u32.totalorder %s1980_s19, %s2611_s1 }
   0xa   :  { %p1986_p2 = pnand %p1984_p1, %p1981_p0 }
   0xc   :  { %1989 = shalt.err (!%p1986_p2)
}
   0xd   :  { %s1990_s24 = scalar_lea.vmem %s40_s14, 256  ;;  %p1995_p4 = scmp.lt.s32.totalorder %s40_s14, %s40_s14 }
   0xe   :  { %p1991_p3 = scmp.ne.s32.totalorder %s40_s14, %s1990_s24  ;;  %p1996_p5 = scmp.lt.s32.totalorder %s1990_s24, %s1990_s24 }
  0x10   :  { %p1997_p6 = por %p1996_p5, %p1995_p4 }
  0x12   :  { %p1998_p7 = pnand %p1997_p6, %p1991_p3 }
  0x14   :  { %2001 = shalt.err (!%p1998_p7)
}
  0x15   :  { %s2170_s25 = smov 128   ;;  %s2171_s26 = smov 8  }
  0x16   :  { %45 = dma.hbm_to_vmem [thread:$0]  %s2611_s1, 256, %s40_s14, [#allocation6], %s2170_s25, %s2170_s25, %s2171_s26  }
  0x17   :  { %s2002_s11 = scalar_lea.hbm %s2613_s3, 256 }
  0x18   :  { %p2003_p8 = scmp.ne.s32.totalorder %s2613_s3, %s2002_s11  ;;  %p2006_p9 = scmp.lt.u32.totalorder %s2002_s11, %s2613_s3 }
  0x1a   :  { %p2008_p10 = pnand %p2006_p9, %p2003_p8 }
  0x1c   :  { %2011 = shalt.err (!%p2008_p10)
}
  0x1d   :  { %s2012_s18 = scalar_lea.vmem %s2244_s16, 256  ;;  %p2017_p12 = scmp.lt.s32.totalorder %s2244_s16, %s2244_s16 }
  0x1e   :  { %p2013_p11 = scmp.ne.s32.totalorder %s2244_s16, %s2012_s18  ;;  %p2018_p13 = scmp.lt.s32.totalorder %s2012_s18, %s2012_s18 }
  0x20   :  { %p2019_p0 = por %p2018_p13, %p2017_p12 }
  0x22   :  { %p2020_p1 = pnand %p2019_p0, %p2013_p11 }
  0x24   :  { %2023 = shalt.err (!%p2020_p1)
}
  0x25   :  { %69 = dma.hbm_to_vmem [thread:$0]  %s2613_s3, 256, %s2244_s16, [#allocation9], %s2170_s25, %s2170_s25, %s2171_s26  }
  0x26   :  { %s2172_s19 = smov [#allocation2]   ;;  %s2173_s21 = smov [#allocation7]  }
  0x27   :  { %s27_s20 = sshll.u32 %s2172_s19, 4  ;;  %s51_s22 = sshll.u32 %s2173_s21, 4  ;;  %s28_s20 = int_to_ptr.vmem [resolvable:$true] %s27_s20  ;;  %s2281_s22 = int_to_ptr.vmem [resolvable:$true] %s51_s22 }
  0x28   :  { %s2024_s27 = scalar_lea.hbm %s2610_s0, 256 }
  0x29   :  { %p2025_p2 = scmp.ne.s32.totalorder %s2610_s0, %s2024_s27  ;;  %p2028_p3 = scmp.lt.u32.totalorder %s2024_s27, %s2610_s0 }
  0x2b   :  { %p2030_p4 = pnand %p2028_p3, %p2025_p2 }
  0x2d   :  { %2033 = shalt.err (!%p2030_p4)
}
  0x2e   :  { %s2034_s3 = scalar_lea.vmem %s28_s20, 256  ;;  %p2039_p6 = scmp.lt.s32.totalorder %s28_s20, %s28_s20 }
  0x2f   :  { %p2035_p5 = scmp.ne.s32.totalorder %s28_s20, %s2034_s3  ;;  %p2040_p7 = scmp.lt.s32.totalorder %s2034_s3, %s2034_s3 }
  0x31   :  { %p2041_p8 = por %p2040_p7, %p2039_p6 }
  0x33   :  { %p2042_p9 = pnand %p2041_p8, %p2035_p5 }
  0x35   :  { %2045 = shalt.err (!%p2042_p9)
}
  0x36   :  { %33 = dma.hbm_to_vmem [thread:$0]  %s2610_s0, 256, %s28_s20, [#allocation3], %s2170_s25, %s2170_s25, %s2171_s26  }
  0x37   :  { %s2046_s17 = scalar_lea.hbm %s2612_s2, 256 }
  0x38   :  { %p2047_p10 = scmp.ne.s32.totalorder %s2612_s2, %s2046_s17  ;;  %p2050_p11 = scmp.lt.u32.totalorder %s2046_s17, %s2612_s2 }
  0x3a   :  { %p2052_p12 = pnand %p2050_p11, %p2047_p10 }
  0x3c   :  { %2055 = shalt.err (!%p2052_p12)
}
  0x3d   :  { %s2056_s21 = scalar_lea.vmem %s2281_s22, 256  ;;  %p2061_p0 = scmp.lt.s32.totalorder %s2281_s22, %s2281_s22 }
  0x3e   :  { %p2057_p13 = scmp.ne.s32.totalorder %s2281_s22, %s2056_s21  ;;  %p2062_p1 = scmp.lt.s32.totalorder %s2056_s21, %s2056_s21 }
  0x40   :  { %p2063_p2 = por %p2062_p1, %p2061_p0 }
  0x42   :  { %p2064_p3 = pnand %p2063_p2, %p2057_p13 }
  0x44   :  { %2067 = shalt.err (!%p2064_p3)
}
  0x45   :  { %57 = dma.hbm_to_vmem [thread:$0]  %s2612_s2, 256, %s2281_s22, [#allocation6], %s2170_s25, %s2170_s25, %s2171_s26  }
  0x46   :  { %s2174_s23 = smov [#allocation10]   ;;  %s2068_s29 = scalar_lea.hbm %s2615_s5, 512 }
  0x47   :  { %s77_s24 = sshll.u32 %s2174_s23, 4  ;;  %p2069_p4 = scmp.ne.s32.totalorder %s2615_s5, %s2068_s29  ;;  %s78_s24 = int_to_ptr.vmem [resolvable:$true] %s77_s24 }
  0x48   :  { %p2072_p5 = scmp.lt.u32.totalorder %s2068_s29, %s2615_s5 }
  0x4a   :  { %p2074_p6 = pnand %p2072_p5, %p2069_p4 }
  0x4c   :  { %2077 = shalt.err (!%p2074_p6)
}
  0x4d   :  { %s2078_s12 = scalar_lea.vmem %s78_s24, 512  ;;  %p2083_p8 = scmp.lt.s32.totalorder %s78_s24, %s78_s24 }
  0x4e   :  { %p2079_p7 = scmp.ne.s32.totalorder %s78_s24, %s2078_s12  ;;  %p2084_p9 = scmp.lt.s32.totalorder %s2078_s12, %s2078_s12 }
  0x50   :  { %p2085_p10 = por %p2084_p9, %p2083_p8 }
  0x52   :  { %p2086_p11 = pnand %p2085_p10, %p2079_p7 }
  0x54   :  { %2089 = shalt.err (!%p2086_p11)
}
  0x55   :  { %s2175_s2 = smov 64   ;;  %s2176_s22 = smov 4  }
  0x56   :  { %83 = dma.hbm_to_vmem [thread:$0]  %s2615_s5, 512, %s78_s24, [#allocation9], %s2175_s2, %s2175_s2, %s2176_s22  }
  0x57   :  { %s2177_s17 = smov [#allocation11]   ;;  %s2090_s19 = scalar_lea.hbm %s2616_s6, 1024 }
  0x58   :  { %s89_s18 = sshll.u32 %s2177_s17, 4  ;;  %p2091_p12 = scmp.ne.s32.totalorder %s2616_s6, %s2090_s19  ;;  %s90_s18 = int_to_ptr.vmem [resolvable:$true] %s89_s18 }
  0x59   :  { %p2094_p13 = scmp.lt.u32.totalorder %s2090_s19, %s2616_s6 }
  0x5b   :  { %p2096_p0 = pnand %p2094_p13, %p2091_p12 }
  0x5d   :  { %2099 = shalt.err (!%p2096_p0)
}
  0x5e   :  { %s2100_s27 = scalar_lea.vmem %s90_s18, 1024  ;;  %p2105_p2 = scmp.lt.s32.totalorder %s90_s18, %s90_s18 }
  0x5f   :  { %p2101_p1 = scmp.ne.s32.totalorder %s90_s18, %s2100_s27  ;;  %p2106_p3 = scmp.lt.s32.totalorder %s2100_s27, %s2100_s27 }
  0x61   :  { %p2107_p4 = por %p2106_p3, %p2105_p2 }
  0x63   :  { %p2108_p5 = pnand %p2107_p4, %p2101_p1 }
  0x65   :  { %2111 = shalt.err (!%p2108_p5)
}
  0x66   :  { %95 = dma.hbm_to_vmem [thread:$0]  %s2616_s6, 1024, %s90_s18, [#allocation12], %s2170_s25, %s2170_s25, %s2171_s26  }
  0x67   :  { %2156 = dma.done.wait [#allocation3], 256  }
  0x68   :  { %2157 = vsyncadd [#allocation3], 4294967040 }
  0x69   :  { %2158 = dma.done.wait [#allocation6], 512  }
  0x6a   :  { %2159 = vsyncadd [#allocation6], 4294966784 }
  0x6b   :  { %2160 = dma.done.wait [#allocation9], 768  }
  0x6c   :  { %2161 = vsyncadd [#allocation9], 4294966528 }
  0x6d   :  { %2162 = dma.done.wait [#allocation12], 1024  }
  0x6e   :  { %2163 = vsyncadd [#allocation12], 4294966272  ;;  %v2347_v0 = vld [vmem:[#allocation2] sm:$0xff]  ;;  %vm130_vm0 = vcmask 523264   ;;  %v2349_v1 = vld [vmem:[#allocation2 + $0x8] sm:$0xff]  ;;  %v2178_v11 = vmov 0  }
  0x6f   :  { %v128_v2 = vmul.f32 %v2347_v0, %v2347_v0  ;;  %v129_v3 = vmul.f32 %v2349_v1, %v2349_v1  ;;  %v1888_v6 = vld [vmem:[%s2614_s4 + $0x4] ss:$12 sps:$4 sm:$0xff]   ;;  %v1890_v7 = vld [vmem:[%s2614_s4] ss:$12 sps:$4 sm:$0xff]   ;;  %v1891_v8 = vld [vmem:[%s2614_s4 + $0x1c] ss:$12 sps:$4 sm:$0xff]   ;;  %268 = vmatprep.mubr.bf16.mxu0 %v2178_v11 }
  0x70   :  { %236 = vmatprep.subr.bf16.mxu0 %v1888_v6  ;;  %v1893_v9 = vld [vmem:[%s2614_s4 + $0x18] ss:$12 sps:$4 sm:$0xff]   ;;  %v1894_v10 = vld [vmem:[%s2614_s4 + $0x34] ss:$12 sps:$4 sm:$0xff]   ;;  %v1896_v12 = vld [vmem:[%s2614_s4 + $0x30] ss:$12 sps:$4 sm:$0xff]  }
  0x71   :  { %v131_v4 = vsel %vm130_vm0, %v128_v2, 0.0  ;;  %v134_v5 = vsel %vm130_vm0, %v129_v3, 0.0  ;;  %237 = vmatpush1.bf16.msra.mxu0 %v1890_v7  ;;  %v1897_v13 = vld [vmem:[%s2614_s4 + $0x4c] ss:$12 sps:$4 sm:$0xff]   ;;  %v1899_v14 = vld [vmem:[%s2614_s4 + $0x48] ss:$12 sps:$4 sm:$0xff]  }
  0x72   :  { %132 = vadd.xlane.f32.xlu0 %v131_v4  ;;  %238 = vmatprep.subr.bf16.mxu0 %v1891_v8  ;;  %v2179_v15 = vmov 0.0   ;;  %v123_v16 = vld [vmem:[#allocation7] sm:$0xff]  ;;  %v124_v17 = vld [vmem:[#allocation7 + $0x8] sm:$0xff]  ;;  %vm2180_vm1 = vmmov 0   ;;  %v1903_v35 = vld [vmem:[%s2614_s4 + $0x50] ss:$12 sps:$4 sm:$0xff]  }
  0x73   :  { %332 = vrot.lane.b32.xlu1 %v123_v16, %s2175_s2  ;;  %v1561_v27 = vld [vmem:[%s2618_s8] ss:$0 sm:$0xff]  ;;  %v1900_v31 = vld [vmem:[%s2614_s4 + $0x8] ss:$12 sps:$4 sm:$0xff]   ;;  %v1902_v34 = vld [vmem:[%s2614_s4 + $0x38] ss:$12 sps:$4 sm:$0xff]  }
  0x74   :  { %v1901_v33 = vld [vmem:[%s2614_s4 + $0x20] ss:$12 sps:$4 sm:$0xff]   ;;  %v121_v37 = vld [vmem:[#allocation5] sm:$0xff]  ;;  %v122_v39 = vld [vmem:[#allocation5 + $0x8] sm:$0xff]  ;;  %vm350_vm2 = vcmask 130048   ;;  %s2181_s4 = smov 112  }
  0x75   :  { %239 = vmatpush1.bf16.msra.mxu0 %v1893_v9  ;;  %vm2413_vm3 = vmpackc.low %vm350_vm2, %vm350_vm2  ;;  %v2440_v9 = vld [vmem:[#allocation8 + $0x8] sm:$0xff]  ;;  %s2182_s30 = smov 96   ;;  %s2184_s11 = smov 48   ;;  %vm1173_vm4 = vcmask 261120   ;;  %vm1176_vm5 = vcmask 392192  }
  0x76   :  { %135 = vadd.xlane.f32.xlu0 %v134_v5  ;;  %240 = vmatprep.subr.bf16.mxu0 %v1894_v10  ;;  %v2442_v10 = vld [vmem:[#allocation8] sm:$0xff]  ;;  %s2185_s3 = smov 32   ;;  %s2186_s16 = smov 16  }
  0x77   :  { %334 = vrot.lane.b32.xlu1 %v124_v17, %s2175_s2 }
  0x79   :  { %241 = vmatpush1.bf16.msra.mxu0 %v1896_v12 }
  0x7a   :  { %242 = vmatprep.subr.bf16.mxu0 %v1897_v13 }
  0x7d   :  { %243 = vmatpush1.bf16.msra.mxu0 %v1899_v14 }
  0x7e   :  { %1677 = vmatprep.subr.bf16.mxu0 %v2179_v15 }
  0xe5   :  { %v333_v36 = vpop.permute.xlu1 %332 }
  0xe9   :  { %v335_v42 = vpop.permute.xlu1 %334 }
  0xff   :  { %v133_v18 = vpop.xlane.xlu0 %132 }
 0x100   :  { %v138_v19 = vmul.f32 0.015625, %v133_v18 }
 0x102   :  { %v140_v20 = vadd.f32 1e-06, %v138_v19 }
 0x103   :  { %v136_v21 = vpop.xlane.xlu0 %135 }
 0x104   :  { %1928 = vrsqrt.f32 %v140_v20  ;;  %v139_v22 = vmul.f32 0.015625, %v136_v21 }
 0x106   :  { %v141_v23 = vadd.f32 1e-06, %v139_v22 }
 0x108   :  { %1930 = vrsqrt.f32 %v141_v23 }
 0x10e   :  { %v1929_v24 = vpop.eup %1928 }
 0x10f   :  { %v144_v25 = vmul.f32 %v1929_v24, %v2347_v0 }
 0x111   :  { %v150_v29 = vmul.f32 %v1561_v27, %v144_v25 }
 0x112   :  { %v1931_v26 = vpop.eup %1930 }
 0x113   :  { %v145_v28 = vmul.f32 %v1931_v26, %v2349_v1 }
 0x115   :  { %v151_v30 = vmul.f32 %v1561_v27, %v145_v28 }
 0x117   :  { %v152_v32 = vpack.c.bf16 %v151_v30, %v150_v29 }
 0x119   :  { %1574 = vmatmul.mubr.msk.bf16.vlgmr.msra.gmra.mrb[0].mxu0 %vm130_vm0, %v152_v32 }
 0x11a   :  { %1678 = vmatpush3.bf16.msra.mxu0 %v1900_v31  ;;  %1685 = vmatprep.mubr.msk.bf16.mxu0 %vm2180_vm1, %v2179_v15 }
 0x11b   :  { %1679 = vmatprep.subr.bf16.mxu0 %v2179_v15 }
 0x11e   :  { %1680 = vmatpush3.bf16.msra.mxu0 %v1901_v33 }
 0x11f   :  { %1681 = vmatprep.subr.bf16.mxu0 %v2179_v15 }
 0x122   :  { %1682 = vmatpush3.bf16.msra.mxu0 %v1902_v34 }
 0x123   :  { %1683 = vmatprep.subr.bf16.mxu0 %v2179_v15 }
 0x126   :  { %1684 = vmatpush3.bf16.msra.mxu0 %v1903_v35 }
 0x129   :  { %1686 = vmatmul.mubr.msk.bf16.vlgmr.msra.gmra.mrb[4].mxu0 %vm130_vm0, %v152_v32 }
 0x1ec   :  { %v270_v38 = vpop.f32.mrb[0].mxu0 }
 0x1ed   :  { %v320_v40 = vmul.f32 %v270_v38, %v121_v37  ;;  %v272_v41 = vpop.f32.mrb[1].mxu0 }
 0x1ee   :  { %v322_v43 = vmul.f32 %v272_v41, %v123_v16  ;;  %v274_v44 = vpop.f32.mrb[2].mxu0  ;;  %v338_v45 = vmul.f32 %v333_v36, %v272_v41 }
 0x1ef   :  { %v321_v46 = vmul.f32 %v274_v44, %v122_v39  ;;  %v276_v47 = vpop.f32.mrb[3].mxu0 }
 0x1f0   :  { %v324_v48 = vadd.f32 %v322_v43, %v320_v40  ;;  %v323_v49 = vmul.f32 %v276_v47, %v124_v17  ;;  %342 = vrot.lane.b32.xlu0 %v338_v45, %s2175_s2  ;;  %v339_v50 = vmul.f32 %v335_v42, %v276_v47 }
 0x1f2   :  { %326 = vst [vmem:[#allocation14] sm:$0xff] %v324_v48  ;;  %v325_v51 = vadd.f32 %v323_v49, %v321_v46  ;;  %344 = vrot.lane.b32.xlu1 %v339_v50, %s2175_s2 }
 0x1f4   :  { %327 = vst [vmem:[#allocation14 + $0x8] sm:$0xff] %v325_v51  ;;  %v2417_v53 = vpack.i.bf16 %v325_v51, %v324_v48  ;;  %v1777_v54 = vpack.c.bf16 %v325_v51, %v324_v48 }
 0x1f6   :  { %1839 = vrot.lane.b32.xlu1 %v2417_v53, %s2181_s4  ;;  %1779 = vmatprep.subr.msk.bf16.mxu0 %vm2413_vm3, %v1777_v54 }
 0x1f7   :  { %1782 = vmatpush3.bf16.xpose.msk.msra.mxu0 %vm2413_vm3, %v1777_v54 }
 0x1fc   :  { %v313_v55 = vpop.f32.mrb[4].mxu0 }
 0x1fd   :  { %v328_v56 = vmul.f32 %v313_v55, %v121_v37  ;;  %v1687_v57 = vpop.f32.mrb[5].mxu0 }
 0x1fe   :  { %v316_v58 = vpop.f32.mrb[6].mxu0 }
 0x1ff   :  { %v329_v59 = vmul.f32 %v316_v58, %v122_v39  ;;  %v1688_v60 = vpop.f32.mrb[7].mxu0 }
 0x262   :  { %v343_v61 = vpop.permute.xlu0 %342 }
 0x263   :  { %v2424_v62 = vadd.f32 %v343_v61, %v328_v56 }
 0x264   :  { %v345_v63 = vpop.permute.xlu1 %344 }
 0x265   :  { %v2426_v2 = vadd.f32 %v345_v63, %v329_v59  ;;  %547 = vrot.lane.b32.xlu1 %v2424_v62, %s2181_s4  ;;  %1693 = vmatprep.mubr.msk.f32.mxu0 %vm350_vm2, %v2424_v62 }
 0x267   :  { %1694 = vmatmul.mubr.msk.f32.vlgmr.msra.gmra.mrb[8].mxu0 %vm350_vm2, %v2426_v2 }
 0x268   :  { %v1840_v3 = vpop.permute.xlu1 %1839 }
 0x269   :  { %v1842_v4 = vunpack.i.h.bf16 %v1840_v3  ;;  %v1841_v5 = vunpack.i.l.bf16 %v1840_v3  ;;  %549 = vrot.lane.b32.xlu1 %v2426_v2, %s2181_s4 }
 0x26b   :  { %v1787_v6 = vpack.c.bf16 %v1842_v4, %v1841_v5 }
 0x26d   :  { %1789 = vmatprep.subr.msk.bf16.mxu0 %vm2413_vm3, %v1787_v6 }
 0x26e   :  { %1792 = vmatpush3.bf16.xpose.msk.msra.mxu0 %vm2413_vm3, %v1787_v6 }
 0x2d7   :  { %v548_v7 = vpop.permute.xlu1 %547 }
 0x2d8   :  { %1707 = vmatprep.mubr.msk.f32.mxu0 %vm350_vm2, %v548_v7 }
 0x2db   :  { %v550_v8 = vpop.permute.xlu1 %549 }
 0x2dc   :  { %1708 = vmatmul.mubr.msk.f32.vlgmr.msra.gmra.mrb[10].mxu0 %vm350_vm2, %v550_v8 }
 0x33a   :  { %v1695_v12 = vpop.f32.mrb[8].mxu0 }
 0x33b   :  { %v435_v13 = vadd.f32 %v1695_v12, %v2440_v9  ;;  %v429_v14 = vpop.f32.mrb[9].mxu0 }
 0x33c   :  { %v430_v16 = vadd.f32 %v429_v14, %v2442_v10 }
 0x33d   :  { %v441_v17 = vsel %vm350_vm2, %v435_v13, -inf }
 0x33e   :  { %442 = vmax.xlane.f32.xlu0 %v441_v17  ;;  %v438_v18 = vsel %vm350_vm2, %v430_v16, -inf }
 0x33f   :  { %439 = vmax.xlane.f32.xlu1 %v438_v18 }
 0x3af   :  { %v1709_v19 = vpop.f32.mrb[10].mxu0 }
 0x3b0   :  { %v635_v20 = vadd.f32 %v1709_v19, %v2440_v9  ;;  %v629_v21 = vpop.f32.mrb[11].mxu0 }
 0x3b1   :  { %v630_v22 = vadd.f32 %v629_v21, %v2442_v10 }
 0x3b2   :  { %v641_v23 = vsel %vm350_vm2, %v635_v20, -inf }
 0x3b3   :  { %642 = vmax.xlane.f32.xlu0 %v641_v23  ;;  %v638_v24 = vsel %vm350_vm2, %v630_v22, -inf }
 0x3b4   :  { %639 = vmax.xlane.f32.xlu1 %v638_v24 }
 0x3c5   :  { %1844 = vrot.lane.b32.xlu1 %v2417_v53, %s2175_s2  ;;  %s2183_s2 = smov 80  }
 0x3cb   :  { %v443_v25 = vpop.xlane.xlu0 %442 }
 0x3cc   :  { %v445_v26 = vsub.f32 %v435_v13, %v443_v25  ;;  %v440_v28 = vpop.xlane.xlu1 %439 }
 0x3cd   :  { %v444_v29 = vsub.f32 %v430_v16, %v440_v28 }
 0x3ce   :  { %v448_v27 = vmul.f32 1.442695, %v445_v26 }
 0x3cf   :  { %v446_v30 = vmul.f32 1.442695, %v444_v29 }
 0x3d0   :  { %1932 = vpow2.f32 %v448_v27 }
 0x3d1   :  { %1934 = vpow2.f32 %v446_v30 }
 0x3da   :  { %v1933_v31 = vpop.eup %1932 }
 0x3db   :  { %v453_v32 = vsel %vm350_vm2, %v1933_v31, 0.0  ;;  %v1935_v33 = vpop.eup %1934 }
 0x3dc   :  { %454 = vadd.xlane.f32.xlu0 %v453_v32  ;;  %v450_v34 = vsel %vm350_vm2, %v1935_v33, 0.0 }
 0x3e9   :  { %451 = vadd.xlane.f32.xlu1 %v450_v34 }
 0x3fa   :  { %1854 = vrot.lane.b32.xlu1 %v2417_v53, %s2182_s30 }
 0x3fe   :  { %1859 = vrot.lane.b32.xlu1 %v2417_v53, %s2183_s2 }
 0x440   :  { %v643_v35 = vpop.xlane.xlu0 %642 }
 0x441   :  { %v645_v36 = vsub.f32 %v635_v20, %v643_v35  ;;  %v640_v37 = vpop.xlane.xlu1 %639 }
 0x442   :  { %v644_v38 = vsub.f32 %v630_v22, %v640_v37 }
 0x443   :  { %v648_v39 = vmul.f32 1.442695, %v645_v36 }
 0x444   :  { %v646_v40 = vmul.f32 1.442695, %v644_v38 }
 0x445   :  { %1936 = vpow2.f32 %v648_v39  ;;  %v1845_v41 = vpop.permute.xlu1 %1844 }
 0x446   :  { %1938 = vpow2.f32 %v646_v40  ;;  %v1847_v42 = vunpack.i.h.bf16 %v1845_v41  ;;  %v1846_v43 = vunpack.i.l.bf16 %v1845_v41 }
 0x448   :  { %v1783_v44 = vpack.c.bf16 %v1847_v42, %v1846_v43 }
 0x44a   :  { %1784 = vmatprep.subr.bf16.mxu1 %v1783_v44 }
 0x44b   :  { %1786 = vmatpush3.bf16.msra.mxu1 %v1783_v44 }
 0x44f   :  { %v1937_v45 = vpop.eup %1936 }
 0x450   :  { %v1939_v46 = vpop.eup %1938  ;;  %v653_v47 = vsel %vm350_vm2, %v1937_v45, 0.0 }
 0x451   :  { %654 = vadd.xlane.f32.xlu0 %v653_v47  ;;  %v650_v48 = vsel %vm350_vm2, %v1939_v46, 0.0 }
 0x452   :  { %651 = vadd.xlane.f32.xlu1 %v650_v48 }
 0x463   :  { %749 = vrot.lane.b32.xlu1 %v2426_v2, %s2182_s30 }
 0x467   :  { %1849 = vrot.lane.b32.xlu0 %v2417_v53, %s2184_s11  ;;  %949 = vrot.lane.b32.xlu1 %v2426_v2, %s2183_s2 }
 0x469   :  { %v455_v49 = vpop.xlane.xlu0 %454 }
 0x46a   :  { %1940 = vrcp.f32 %v455_v49 }
 0x46b   :  { %747 = vrot.lane.b32.xlu0 %v2424_v62, %s2182_s30 }
 0x46f   :  { %947 = vrot.lane.b32.xlu0 %v2424_v62, %s2183_s2 }
 0x474   :  { %v1941_v57 = vpop.eup %1940 }
 0x475   :  { %v459_v61 = vmul.f32 %v1941_v57, %v1933_v31 }
 0x476   :  { %v452_v50 = vpop.xlane.xlu1 %451 }
 0x477   :  { %1942 = vrcp.f32 %v452_v50 }
 0x47a   :  { %v1855_v51 = vpop.permute.xlu1 %1854 }
 0x47b   :  { %v1857_v3 = vunpack.i.h.bf16 %v1855_v51  ;;  %v1856_v4 = vunpack.i.l.bf16 %v1855_v51 }
 0x47d   :  { %v1797_v13 = vpack.c.bf16 %v1857_v3, %v1856_v4 }
 0x47e   :  { %v1860_v54 = vpop.permute.xlu1 %1859 }
 0x47f   :  { %v1862_v55 = vunpack.i.h.bf16 %v1860_v54  ;;  %v1861_v56 = vunpack.i.l.bf16 %v1860_v54 }
 0x481   :  { %v1943_v58 = vpop.eup %1942  ;;  %v1807_v59 = vpack.c.bf16 %v1862_v55, %v1861_v56 }
 0x482   :  { %v458_v60 = vmul.f32 %v1943_v58, %v1935_v33 }
 0x483   :  { %1809 = vmatprep.subr.msk.bf16.mxu0 %vm2413_vm3, %v1807_v59 }
 0x484   :  { %1700 = vmatprep.mubr.msk.f32.mxu1 %vm350_vm2, %v458_v60  ;;  %1812 = vmatpush3.bf16.xpose.msk.msra.mxu0 %vm2413_vm3, %v1807_v59 }
 0x485   :  { %1701 = vmatmul.mubr.msk.f32.vlgmr.msra.gmra.mrb[0].mxu1 %vm350_vm2, %v459_v61 }
 0x4de   :  { %v655_v62 = vpop.xlane.xlu0 %654 }
 0x4df   :  { %1944 = vrcp.f32 %v655_v62  ;;  %v652_v63 = vpop.xlane.xlu1 %651 }
 0x4e0   :  { %1946 = vrcp.f32 %v652_v63 }
 0x4e2   :  { %v1850_v2 = vpop.permute.xlu0 %1849 }
 0x4e3   :  { %v1852_v5 = vunpack.i.h.bf16 %v1850_v2  ;;  %v1851_v6 = vunpack.i.l.bf16 %v1850_v2  ;;  %v750_v8 = vpop.permute.xlu1 %749 }
 0x4e5   :  { %v1793_v7 = vpack.c.bf16 %v1852_v5, %v1851_v6 }
 0x4e6   :  { %v748_v12 = vpop.permute.xlu0 %747 }
 0x4e7   :  { %1794 = vmatprep.subr.bf16.mxu1 %v1793_v7  ;;  %v950_v18 = vpop.permute.xlu1 %949 }
 0x4e8   :  { %1796 = vmatpush3.bf16.msra.mxu1 %v1793_v7 }
 0x4e9   :  { %v1945_v14 = vpop.eup %1944  ;;  %1799 = vmatprep.subr.msk.bf16.mxu1 %vm2413_vm3, %v1797_v13 }
 0x4ea   :  { %v1947_v16 = vpop.eup %1946  ;;  %v948_v17 = vpop.permute.xlu0 %947  ;;  %v659_v20 = vmul.f32 %v1945_v14, %v1937_v45 }
 0x4eb   :  { %1735 = vmatprep.mubr.msk.f32.mxu0 %vm350_vm2, %v948_v17  ;;  %v658_v19 = vmul.f32 %v1947_v16, %v1939_v46  ;;  %v1904_v17 = vld [vmem:[#allocation10] sm:$0xff]  }
 0x4ec   :  { %1736 = vmatmul.mubr.msk.f32.vlgmr.msra.gmra.mrb[12].mxu0 %vm350_vm2, %v950_v18  ;;  %v1905_v18 = vld [vmem:[#allocation10 + $0x8] sm:$0xff]  }
 0x4ed   :  { %1714 = vmatprep.mubr.msk.f32.mxu1 %vm350_vm2, %v658_v19  ;;  %1365 = vmatprep.mubr.bf16.mxu0 %v2178_v11  ;;  %v1906_v19 = vld [vmem:[#allocation10 + $0x10] sm:$0xff]  }
 0x4ee   :  { %1715 = vmatmul.mubr.msk.f32.vlgmr.msra.gmra.mrb[2].mxu1 %vm350_vm2, %v659_v20  ;;  %v1907_v20 = vld [vmem:[#allocation10 + $0x18] sm:$0xff]  }
 0x4ef   :  { %1721 = vmatprep.mubr.msk.f32.mxu1 %vm350_vm2, %v748_v12 }
 0x4f1   :  { %1802 = vmatpush3.bf16.xpose.msk.msra.mxu1 %vm2413_vm3, %v1797_v13 }
 0x4f8   :  { %1722 = vmatmul.mubr.msk.f32.vlgmr.msra.gmra.mrb[4].mxu1 %vm350_vm2, %v750_v8 }
 0x558   :  { %v2483_v21 = vpop.f32.mrb[0].mxu1 }
 0x559   :  { %v2485_v22 = vpop.f32.mrb[1].mxu1 }
 0x5bf   :  { %v1737_v23 = vpop.f32.mrb[12].mxu0 }
 0x5c0   :  { %v1029_v24 = vpop.f32.mrb[13].mxu0  ;;  %v1035_v33 = vadd.f32 %v1737_v23, %v2440_v9 }
 0x5c1   :  { %v1716_v25 = vpop.f32.mrb[2].mxu1  ;;  %v1030_v31 = vadd.f32 %v1029_v24, %v2442_v10 }
 0x5c2   :  { %v738_v26 = vpop.f32.mrb[3].mxu1  ;;  %v1041_v35 = vsel %vm350_vm2, %v1035_v33, -inf }
 0x5c3   :  { %v1873_v27 = vpack.i.bf16 %v1716_v25, %v738_v26  ;;  %v1038_v34 = vsel %vm350_vm2, %v1030_v31, -inf }
 0x5cb   :  { %v1723_v28 = vpop.f32.mrb[4].mxu1 }
 0x5cc   :  { %v835_v11 = vadd.f32 %v1723_v28, %v2440_v9  ;;  %v829_v29 = vpop.f32.mrb[5].mxu1 }
 0x5cd   :  { %v830_v30 = vadd.f32 %v829_v29, %v2442_v10 }
 0x5ce   :  { %v841_v52 = vsel %vm350_vm2, %v835_v11, -inf }
 0x5cf   :  { %842 = vmax.xlane.f32.xlu1 %v841_v52  ;;  %v838_v32 = vsel %vm350_vm2, %v830_v30, -inf }
 0x5d0   :  { %839 = vmax.xlane.f32.xlu0 %v838_v32 }
 0x5d4   :  { %1039 = vmax.xlane.f32.xlu0 %v1038_v34 }
 0x5d8   :  { %1042 = vmax.xlane.f32.xlu0 %v1041_v35 }
 0x65c   :  { %v843_v38 = vpop.xlane.xlu1 %842 }
 0x65d   :  { %v840_v36 = vpop.xlane.xlu0 %839  ;;  %v845_v41 = vsub.f32 %v835_v11, %v843_v38 }
 0x65e   :  { %v844_v37 = vsub.f32 %v830_v30, %v840_v36 }
 0x65f   :  { %v848_v45 = vmul.f32 1.442695, %v845_v41 }
 0x660   :  { %v846_v42 = vmul.f32 1.442695, %v844_v37 }
 0x661   :  { %v1040_v39 = vpop.xlane.xlu0 %1039 }
 0x662   :  { %v1044_v40 = vsub.f32 %v1030_v31, %v1040_v39 }
 0x664   :  { %v1046_v10 = vmul.f32 1.442695, %v1044_v40 }
 0x665   :  { %v1043_v43 = vpop.xlane.xlu0 %1042 }
 0x666   :  { %1948 = vpow2.f32 %v1046_v10  ;;  %v1045_v44 = vsub.f32 %v1035_v33, %v1043_v43 }
 0x667   :  { %1950 = vpow2.f32 %v846_v42 }
 0x668   :  { %v1048_v9 = vmul.f32 1.442695, %v1045_v44 }
 0x66a   :  { %1952 = vpow2.f32 %v1048_v9 }
 0x66b   :  { %1954 = vpow2.f32 %v848_v45 }
 0x670   :  { %v1949_v46 = vpop.eup %1948 }
 0x671   :  { %v1050_v47 = vsel %vm350_vm2, %v1949_v46, 0.0  ;;  %v1951_v48 = vpop.eup %1950 }
 0x672   :  { %1051 = vadd.xlane.f32.xlu1 %v1050_v47  ;;  %v850_v50 = vsel %vm350_vm2, %v1951_v48, 0.0 }
 0x674   :  { %v1953_v49 = vpop.eup %1952 }
 0x675   :  { %v1053_v51 = vsel %vm350_vm2, %v1953_v49, 0.0  ;;  %v1955_v54 = vpop.eup %1954 }
 0x676   :  { %851 = vadd.xlane.f32.xlu1 %v850_v50  ;;  %1054 = vadd.xlane.f32.xlu0 %v1053_v51  ;;  %v853_v55 = vsel %vm350_vm2, %v1955_v54, 0.0  ;;  %v1913_v50 = vld [vmem:[#allocation11 + $0x14] ss:$8 sps:$4 sm:$0xff]   ;;  %v1916_v51 = vld [vmem:[#allocation11 + $0x24] ss:$8 sps:$4 sm:$0xff]  }
 0x67a   :  { %854 = vadd.xlane.f32.xlu0 %v853_v55  ;;  %v1917_v55 = vld [vmem:[#allocation11 + $0x30] ss:$8 sps:$4 sm:$0xff]  }
 0x687   :  { %1864 = vrot.lane.b32.xlu1 %v2417_v53, %s2185_s3 }
 0x68b   :  { %1874 = vrot.lane.b32.xlu1 %v1873_v27, %s2186_s16 }
 0x690   :  { %1869 = vrot.lane.b32.xlu0 %v2417_v53, %s2186_s16 }
 0x6ff   :  { %v1052_v56 = vpop.xlane.xlu1 %1051 }
 0x703   :  { %v852_v57 = vpop.xlane.xlu1 %851  ;;  %v1055_v58 = vpop.xlane.xlu0 %1054 }
 0x704   :  { %1956 = vrcp.f32 %v852_v57 }
 0x705   :  { %1958 = vrcp.f32 %v1052_v56  ;;  %v1919_v56 = vld [vmem:[#allocation11 + $0x34] ss:$8 sps:$4 sm:$0xff]  }
 0x707   :  { %v1865_v59 = vpop.permute.xlu1 %1864  ;;  %v855_v60 = vpop.xlane.xlu0 %854 }
 0x708   :  { %v1867_v61 = vunpack.i.h.bf16 %v1865_v59  ;;  %v1866_v62 = vunpack.i.l.bf16 %v1865_v59  ;;  %1960 = vrcp.f32 %v855_v60 }
 0x709   :  { %1962 = vrcp.f32 %v1055_v58 }
 0x70a   :  { %v1803_v63 = vpack.c.bf16 %v1867_v61, %v1866_v62 }
 0x70b   :  { %v1870_v2 = vpop.permute.xlu0 %1869  ;;  %v1875_v11 = vpop.permute.xlu1 %1874 }
 0x70c   :  { %v1872_v3 = vunpack.i.h.bf16 %v1870_v2  ;;  %v1871_v4 = vunpack.i.l.bf16 %v1870_v2  ;;  %1804 = vmatprep.subr.bf16.mxu1 %v1803_v63  ;;  %v1877_v30 = vunpack.i.h.bf16 %v1875_v11  ;;  %v1876_v52 = vunpack.i.l.bf16 %v1875_v11 }
 0x70d   :  { %1806 = vmatpush3.bf16.msra.mxu1 %v1803_v63 }
 0x70e   :  { %v1957_v5 = vpop.eup %1956  ;;  %v1813_v6 = vpack.c.bf16 %v1872_v3, %v1871_v4  ;;  %v1172_v34 = vsel %vm350_vm2, %v2483_v21, %v1877_v30  ;;  %v1171_v35 = vsel %vm350_vm2, %v2485_v22, %v1876_v52  ;;  %v1605_v4 = vld [vmem:[%s2618_s8 + $0x1] ss:$0 sm:$0xff] }
 0x70f   :  { %v858_v53 = vmul.f32 %v1957_v5, %v1951_v48  ;;  %v1959_v7 = vpop.eup %1958 }
 0x710   :  { %1814 = vmatprep.subr.bf16.mxu1 %v1813_v6  ;;  %v1058_v14 = vmul.f32 %v1959_v7, %v1949_v46 }
 0x711   :  { %1728 = vmatprep.mubr.msk.f32.mxu1 %vm350_vm2, %v858_v53 }
 0x712   :  { %v1961_v8 = vpop.eup %1960 }
 0x713   :  { %v859_v12 = vmul.f32 %v1961_v8, %v1955_v54  ;;  %v1963_v13 = vpop.eup %1962  ;;  %v1914_v54 = vld [vmem:[#allocation11 + $0x20] ss:$8 sps:$4 sm:$0xff]  }
 0x714   :  { %v1059_v16 = vmul.f32 %v1963_v13, %v1953_v49  ;;  %v1908_v49 = vld [vmem:[#allocation11] ss:$8 sps:$4 sm:$0xff]   ;;  %v1922_v13 = vld [vmem:[%s2617_s7 + $0x10] sm:$0xff]  }
 0x715   :  { %1729 = vmatmul.mubr.msk.f32.vlgmr.msra.gmra.mrb[6].mxu1 %vm350_vm2, %v859_v12  ;;  %v1920_v8 = vld [vmem:[%s2617_s7] sm:$0xff]   ;;  %v1921_v12 = vld [vmem:[%s2617_s7 + $0x8] sm:$0xff]  }
 0x716   :  { %1816 = vmatpush3.bf16.msra.mxu1 %v1813_v6  ;;  %1742 = vmatprep.mubr.msk.f32.mxu1 %vm350_vm2, %v1058_v14  ;;  %v1923_v14 = vld [vmem:[%s2617_s7 + $0x18] sm:$0xff]  }
 0x717   :  { %1745 = vmatprep.subr.bf16.mxu1 %v2179_v15 }
 0x719   :  { %1743 = vmatmul.mubr.msk.f32.vlgmr.msra.gmra.mrb[8].mxu1 %vm350_vm2, %v1059_v16  ;;  %v1924_v16 = vld [vmem:[%s2617_s7 + $0x20] sm:$0xff]  }
 0x71a   :  { %1753 = vmatprep.mubr.msk.bf16.mxu1 %vm2180_vm1, %v2179_v15  ;;  %1746 = vmatpush3.bf16.msra.mxu1 %v1904_v17  ;;  %v1925_v17 = vld [vmem:[%s2617_s7 + $0x28] sm:$0xff]  }
 0x71b   :  { %1747 = vmatprep.subr.bf16.mxu1 %v2179_v15 }
 0x71e   :  { %1748 = vmatpush3.bf16.msra.mxu1 %v1905_v18  ;;  %v1926_v18 = vld [vmem:[%s2617_s7 + $0x30] sm:$0xff]  }
 0x71f   :  { %1749 = vmatprep.subr.bf16.mxu1 %v2179_v15 }
 0x722   :  { %1750 = vmatpush3.bf16.msra.mxu1 %v1906_v19  ;;  %v1927_v19 = vld [vmem:[%s2617_s7 + $0x38] sm:$0xff]   ;;  %s2187_s7 = smov [#allocation14]  }
 0x723   :  { %1751 = vmatprep.subr.bf16.mxu1 %v2179_v15  ;;  %s1542_s29 = sshll.u32 %s2187_s7, 4  ;;  %s1543_s29 = int_to_ptr.vmem [resolvable:$true] %s1542_s29 }
 0x724   :  { %s2112_s4 = scalar_lea.vmem %s1543_s29, 256  ;;  %p2117_p7 = scmp.lt.s32.totalorder %s1543_s29, %s1543_s29 }
 0x725   :  { %p2113_p6 = scmp.ne.s32.totalorder %s1543_s29, %s2112_s4  ;;  %p2118_p8 = scmp.lt.s32.totalorder %s2112_s4, %s2112_s4 }
 0x726   :  { %1752 = vmatpush3.bf16.msra.mxu1 %v1907_v20 }
 0x727   :  { %1757 = vmatprep.subr.bf16.mxu1 %v2179_v15  ;;  %p2119_p9 = por %p2118_p8, %p2117_p7 }
 0x729   :  { %p2120_p10 = pnand %p2119_p9, %p2113_p6 }
 0x7e8   :  { %v1730_v23 = vpop.f32.mrb[6].mxu1 }
 0x7e9   :  { %v938_v24 = vpop.f32.mrb[7].mxu1 }
 0x7ea   :  { %v1878_v25 = vpack.i.bf16 %v1730_v23, %v938_v24 }
 0x7ec   :  { %1879 = vrot.lane.b32.xlu1 %v1878_v25, %s2185_s3  ;;  %v1744_v26 = vpop.f32.mrb[8].mxu1 }
 0x7ed   :  { %v1138_v27 = vpop.f32.mrb[9].mxu1 }
 0x7ee   :  { %v1883_v28 = vpack.i.bf16 %v1744_v26, %v1138_v27 }
 0x7f0   :  { %1884 = vrot.lane.b32.xlu0 %v1883_v28, %s2184_s11 }
 0x85e   :  { %v1880_v29 = vpop.permute.xlu1 %1879 }
 0x85f   :  { %v1882_v31 = vunpack.i.h.bf16 %v1880_v29  ;;  %v1881_v32 = vunpack.i.l.bf16 %v1880_v29 }
 0x861   :  { %v1175_v38 = vsel %vm1173_vm4, %v1172_v34, %v1882_v31  ;;  %v1174_v39 = vsel %vm1173_vm4, %v1171_v35, %v1881_v32 }
 0x862   :  { %v1885_v33 = vpop.permute.xlu0 %1884 }
 0x863   :  { %v1887_v36 = vunpack.i.h.bf16 %v1885_v33  ;;  %v1886_v37 = vunpack.i.l.bf16 %v1885_v33 }
 0x865   :  { %v1178_v40 = vsel %vm1176_vm5, %v1175_v38, %v1887_v36  ;;  %v1177_v41 = vsel %vm1176_vm5, %v1174_v39, %v1886_v37 }
 0x866   :  { %v1179_v42 = vpack.c.bf16 %v1178_v40, %v1177_v41 }
 0x868   :  { %1754 = vmatmul.mubr.msk.bf16.vlgmr.msra.gmra.mrb[12].mxu1 %vm130_vm0, %v1179_v42 }
 0x869   :  { %1773 = vmatprep.mubr.msk.bf16.mxu1 %vm2180_vm1, %v2179_v15  ;;  %1758 = vmatpush3.bf16.msra.mxu1 %v1920_v8 }
 0x86a   :  { %1759 = vmatprep.subr.bf16.mxu1 %v2179_v15 }
 0x86d   :  { %1760 = vmatpush3.bf16.msra.mxu1 %v1921_v12 }
 0x86e   :  { %1761 = vmatprep.subr.bf16.mxu1 %v2179_v15 }
 0x871   :  { %1762 = vmatpush3.bf16.msra.mxu1 %v1922_v13 }
 0x872   :  { %1763 = vmatprep.subr.bf16.mxu1 %v2179_v15 }
 0x875   :  { %1764 = vmatpush3.bf16.msra.mxu1 %v1923_v14 }
 0x876   :  { %1765 = vmatprep.subr.bf16.mxu1 %v2179_v15 }
 0x879   :  { %1766 = vmatpush3.bf16.msra.mxu1 %v1924_v16 }
 0x87a   :  { %1767 = vmatprep.subr.bf16.mxu1 %v2179_v15 }
 0x87d   :  { %1768 = vmatpush3.bf16.msra.mxu1 %v1925_v17 }
 0x87e   :  { %1769 = vmatprep.subr.bf16.mxu1 %v2179_v15 }
 0x881   :  { %1770 = vmatpush3.bf16.msra.mxu1 %v1926_v18 }
 0x882   :  { %1771 = vmatprep.subr.bf16.mxu1 %v2179_v15 }
 0x885   :  { %1772 = vmatpush3.bf16.msra.mxu1 %v1927_v19 }
 0x93b   :  { %v1249_v10 = vpop.f32.mrb[12].mxu1 }
 0x93c   :  { %v2523_v43 = vadd.f32 %v1249_v10, %v2347_v0  ;;  %v1755_v21 = vpop.f32.mrb[13].mxu1  ;;  %v1910_v0 = vld [vmem:[#allocation11 + $0x4] ss:$8 sps:$4 sm:$0xff]  }
 0x93d   :  { %v1252_v44 = vpop.f32.mrb[14].mxu1  ;;  %1333 = vmatprep.subr.bf16.mxu0 %v1910_v0 }
 0x93e   :  { %v2526_v22 = vadd.f32 %v1252_v44, %v2349_v1  ;;  %v1756_v45 = vpop.f32.mrb[15].mxu1  ;;  %v1259_v9 = vmul.f32 %v2523_v43, %v2523_v43  ;;  %1334 = vmatpush1.bf16.msra.mxu0 %v1908_v49  ;;  %v1911_v1 = vld [vmem:[#allocation11 + $0x10] ss:$8 sps:$4 sm:$0xff]  }
 0x93f   :  { %1335 = vmatprep.subr.bf16.mxu0 %v1913_v50 }
 0x940   :  { %v1261_v46 = vsel %vm130_vm0, %v1259_v9, 0.0  ;;  %v1260_v47 = vmul.f32 %v2526_v22, %v2526_v22 }
 0x941   :  { %1262 = vadd.xlane.f32.xlu1 %v1261_v46 }
 0x942   :  { %v1264_v48 = vsel %vm130_vm0, %v1260_v47, 0.0  ;;  %1336 = vmatpush1.bf16.msra.mxu0 %v1911_v1 }
 0x943   :  { %1265 = vadd.xlane.f32.xlu0 %v1264_v48  ;;  %1337 = vmatprep.subr.bf16.mxu0 %v1916_v51 }
 0x946   :  { %1338 = vmatpush1.bf16.msra.mxu0 %v1914_v54 }
 0x947   :  { %1339 = vmatprep.subr.bf16.mxu0 %v1919_v56 }
 0x94a   :  { %1340 = vmatpush1.bf16.msra.mxu0 %v1917_v55 }
 0x9ce   :  { %v1263_v57 = vpop.xlane.xlu1 %1262 }
 0x9cf   :  { %v1267_v58 = vmul.f32 0.015625, %v1263_v57 }
 0x9d0   :  { %v1266_v59 = vpop.xlane.xlu0 %1265 }
 0x9d1   :  { %v1269_v60 = vadd.f32 1e-06, %v1267_v58  ;;  %v1268_v61 = vmul.f32 0.015625, %v1266_v59 }
 0x9d3   :  { %1964 = vrsqrt.f32 %v1269_v60  ;;  %v1270_v62 = vadd.f32 1e-06, %v1268_v61 }
 0x9d5   :  { %1966 = vrsqrt.f32 %v1270_v62 }
 0x9dd   :  { %v1965_v63 = vpop.eup %1964 }
 0x9de   :  { %v1273_v2 = vmul.f32 %v1965_v63, %v2523_v43 }
 0x9df   :  { %v1967_v3 = vpop.eup %1966 }
 0x9e0   :  { %v1274_v5 = vmul.f32 %v1967_v3, %v2526_v22  ;;  %v1279_v6 = vmul.f32 %v1605_v4, %v1273_v2 }
 0x9e2   :  { %v1280_v53 = vmul.f32 %v1605_v4, %v1274_v5 }
 0x9e4   :  { %v1281_v7 = vpack.c.bf16 %v1280_v53, %v1279_v6 }
 0x9e6   :  { %1614 = vmatmul.mubr.msk.bf16.vlgmr.msra.gmra.mrb[16].mxu0 %vm130_vm0, %v1281_v7 }
 0xab9   :  { %v1367_v20 = vpop.f32.mrb[16].mxu0 }
 0xaba   :  { %v1615_v23 = vmul.f32 -1.442695, %v1367_v20  ;;  %v1369_v24 = vpop.f32.mrb[17].mxu0 }
 0xabb   :  { %v1371_v25 = vpop.f32.mrb[18].mxu0 }
 0xabc   :  { %1968 = vpow2.f32 %v1615_v23  ;;  %v1616_v26 = vmul.f32 -1.442695, %v1371_v25  ;;  %v1373_v27 = vpop.f32.mrb[19].mxu0 }
 0xabe   :  { %1970 = vpow2.f32 %v1616_v26 }
 0xac6   :  { %v1969_v28 = vpop.eup %1968 }
 0xac7   :  { %v1382_v11 = vadd.f32 1.0, %v1969_v28 }
 0xac8   :  { %v1971_v29 = vpop.eup %1970 }
 0xac9   :  { %1972 = vrcp.f32 %v1382_v11  ;;  %v1383_v30 = vadd.f32 1.0, %v1971_v29 }
 0xacb   :  { %1974 = vrcp.f32 %v1383_v30 }
 0xad3   :  { %v1973_v15 = vpop.eup %1972 }
 0xad4   :  { %v1388_v52 = vmul.f32 %v1973_v15, %v1367_v20 }
 0xad5   :  { %v1975_v31 = vpop.eup %1974 }
 0xad6   :  { %v1390_v32 = vmul.f32 %v1388_v52, %v1369_v24  ;;  %v1389_v33 = vmul.f32 %v1975_v31, %v1371_v25 }
 0xad8   :  { %v1391_v34 = vmul.f32 %v1389_v33, %v1373_v27 }
 0xada   :  { %v1392_v35 = vpack.c.bf16 %v1391_v34, %v1390_v32 }
 0xadc   :  { %1774 = vmatmul.mubr.bf16.vlgmr.msra.gmra.mrb[16].mxu1 %v1392_v35 }
 0xbaf   :  { %v1491_v36 = vpop.f32.mrb[16].mxu1 }
 0xbb0   :  { %v1498_v37 = vadd.f32 %v1491_v36, %v2523_v43  ;;  %v1775_v38 = vpop.f32.mrb[17].mxu1 }
 0xbb1   :  { %v1494_v39 = vpop.f32.mrb[18].mxu1 }
 0xbb2   :  { %v1499_v40 = vadd.f32 %v1494_v39, %v2526_v22  ;;  %v1776_v41 = vpop.f32.mrb[19].mxu1  ;;  %v1501_v42 = vmul.f32 %v1498_v37, %v1498_v37 }
 0xbb4   :  { %v1503_v10 = vsel %vm130_vm0, %v1501_v42, 0.0  ;;  %v1502_v21 = vmul.f32 %v1499_v40, %v1499_v40 }
 0xbb5   :  { %1504 = vadd.xlane.f32.xlu0 %v1503_v10 }
 0xbb6   :  { %v1506_v44 = vsel %vm130_vm0, %v1502_v21, 0.0 }
 0xbb7   :  { %1507 = vadd.xlane.f32.xlu1 %v1506_v44 }
 0xbb8   :  { %2123 = shalt.err (!%p2120_p10)
}
 0xbb9   :  { %s2124_s11 = scalar_lea.hbm %s2620_s10, 256 }
 0xbba   :  { %p2125_p11 = scmp.ne.s32.totalorder %s2620_s10, %s2124_s11  ;;  %p2128_p12 = scmp.lt.u32.totalorder %s2124_s11, %s2620_s10 }
 0xbbc   :  { %p2130_p13 = pnand %p2128_p12, %p2125_p11 }
 0xbbe   :  { %2133 = shalt.err (!%p2130_p13)
}
 0xbbf   :  { %1548 = dma.vmem_to_hbm [thread:$0]  %s1543_s29, 256, %s2620_s10, [#allocation15], %s2170_s25, %s2170_s25, %s2171_s26  }
 0xbc0   :  { %v1625_v0 = vld [vmem:[%s2618_s8 + $0x2] ss:$0 sm:$0xff]  ;;  %s2188_s1 = smov [#allocation13]  }
 0xbc1   :  { %s1530_s14 = sshll.u32 %s2188_s1, 4  ;;  %s1531_s14 = int_to_ptr.vmem [resolvable:$true] %s1530_s14 }
 0xbc2   :  { %s2134_s10 = scalar_lea.vmem %s1531_s14, 256  ;;  %p2139_p1 = scmp.lt.s32.totalorder %s1531_s14, %s1531_s14 }
 0xbc3   :  { %p2135_p0 = scmp.ne.s32.totalorder %s1531_s14, %s2134_s10  ;;  %p2140_p2 = scmp.lt.s32.totalorder %s2134_s10, %s2134_s10 }
 0xbc5   :  { %p2141_p3 = por %p2140_p2, %p2139_p1 }
 0xbc7   :  { %p2142_p4 = pnand %p2141_p3, %p2135_p0 }
 0xc42   :  { %v1505_v43 = vpop.xlane.xlu0 %1504 }
 0xc43   :  { %v1509_v22 = vmul.f32 0.015625, %v1505_v43 }
 0xc44   :  { %v1508_v45 = vpop.xlane.xlu1 %1507 }
 0xc45   :  { %v1511_v9 = vadd.f32 1e-06, %v1509_v22  ;;  %v1510_v46 = vmul.f32 0.015625, %v1508_v45 }
 0xc47   :  { %1976 = vrsqrt.f32 %v1511_v9  ;;  %v1512_v47 = vadd.f32 1e-06, %v1510_v46 }
 0xc49   :  { %1978 = vrsqrt.f32 %v1512_v47 }
 0xc51   :  { %v1977_v48 = vpop.eup %1976 }
 0xc52   :  { %v1515_v49 = vmul.f32 %v1977_v48, %v1498_v37 }
 0xc53   :  { %v1979_v50 = vpop.eup %1978 }
 0xc54   :  { %v1516_v1 = vmul.f32 %v1979_v50, %v1499_v40  ;;  %v1521_v51 = vmul.f32 %v1625_v0, %v1515_v49 }
 0xc56   :  { %v1522_v54 = vmul.f32 %v1625_v0, %v1516_v1  ;;  %1523 = vst.msk [vmem:[#allocation13] sm:$0xff] %vm130_vm0, %v1521_v51 }
 0xc58   :  { %1524 = vst.msk [vmem:[#allocation13 + $0x8] sm:$0xff] %vm130_vm0, %v1522_v54 }
 0xc59   :  { %2145 = shalt.err (!%p2142_p4)
}
 0xc5a   :  { %s2146_s21 = scalar_lea.hbm %s2619_s9, 256 }
 0xc5b   :  { %p2147_p5 = scmp.ne.s32.totalorder %s2619_s9, %s2146_s21  ;;  %p2150_p6 = scmp.lt.u32.totalorder %s2146_s21, %s2619_s9 }
 0xc5d   :  { %p2152_p7 = pnand %p2150_p6, %p2147_p5 }
 0xc5f   :  { %2155 = shalt.err (!%p2152_p7)
}
 0xc60   :  { %1536 = dma.vmem_to_hbm [thread:$0]  %s1531_s14, 256, %s2619_s9, [#allocation4], %s2170_s25, %s2170_s25, %s2171_s26  }
 0xc61   :  { %2164 = dma.done.wait [#allocation4], 256  }
 0xc62   :  { %2165 = vsyncadd [#allocation4], 4294967040 }
 0xc63   :  { %2166 = dma.done.wait [#allocation15], 256  }
 0xc64   :  { %2167 = vsyncadd [#allocation15], 4294967040 }
 0xc65   :  { %1555 = vsyncpa [#allocation3], 1 }
 0xc66   :  { %1556 = vsyncpa [#allocation6], 1 }
 0xc67   :  { %1557 = vsyncpa [#allocation9], 1 }
 0xc68   :  { %1558 = vsyncpa [#allocation12], 1 }
 0xc69   :  { %1559 = vsyncpa [#allocation4], 1 }
 0xc6a   :  { %1560 = vsyncpa [#allocation15], 1 }

</bundles_post_ra>
